<compile_context>
chip_gen: v5e
topology: v5e:2x2
jax: 0.10.0
libtpu: 0.0.40
codegen_flags: <defaults>
</compile_context>

<pallas_src>
import functools
import math

import jax
import jax.numpy as jnp
from jax.experimental import pallas as pl
from jax.experimental.pallas import tpu as pltpu


# ----------------------------- parameter init ---------------------------------
def _xavier_uniform(key, shape, fan_in, fan_out):
    bound = math.sqrt(6.0 / (fan_in + fan_out))
    return jax.random.uniform(key, shape, jnp.float32, -bound, bound)


def init_params(key, in_ch=4, embed=64, out_size=5):
    """torch-equivalent init: xavier_uniform(gain=1) weights, zero biases."""
    k1, k2, k3 = jax.random.split(key, 3)
    hid = embed // 2
    # conv (feature extractor): torch weight (E, C, 3, 3)
    wconv = _xavier_uniform(k1, (embed, in_ch, 3, 3),
                            fan_in=in_ch * 9, fan_out=embed * 9)
    # flatten to (E, 9*C) with column index = tap*C + c  (tap = ki*3 + kj)
    wc_flat = wconv.transpose(0, 2, 3, 1).reshape(embed, 9 * in_ch)
    bc = jnp.zeros((embed, 1), jnp.float32)
    # classifier: Linear(E, E//2) -> ReLU -> Linear(E//2, out); torch weight layouts
    w1 = _xavier_uniform(k2, (hid, embed), fan_in=embed, fan_out=hid)          # (hid, E)
    b1 = jnp.zeros((hid, 1), jnp.float32)
    w2 = _xavier_uniform(k3, (out_size, hid), fan_in=hid, fan_out=out_size)    # (out, hid)
    b2 = jnp.zeros((out_size, 1), jnp.float32)
    return wc_flat, bc, w1, b1, w2, b2


# ------------------------------ Pallas kernel ----------------------------------
def _maml_fused_kernel(x_ref, mask_ref, wc_ref, bc_ref, w1_ref, b1_ref,
                       w2_ref, b2_ref, o_ref, *, H, W):
    HW = H * W
    x = x_ref[...].astype(jnp.float32)                 # (C, N), spatial on lanes
    C, N = x.shape
    TB = N // HW

    # --- Conv2d(C, E, 3, padding=1) as ONE MXU matmul -------------------------
    # Stack the 9 shifted + boundary-masked slabs along the contraction axis:
    #   xstack (9*C, N);  conv (E, N) = W_flat (E, 9*C) @ xstack
    slabs = []
    for ki in range(3):
        for kj in range(3):
            tap = ki * 3 + kj
            s = (ki - 1) * W + (kj - 1)                # flat spatial offset of the tap
            xs = x if s == 0 else pltpu.roll(x, (-s) % N, axis=1)
            slabs.append(xs * mask_ref[tap:tap + 1, :])   # precomputed (1, N) mask
    xstack = jnp.concatenate(slabs, axis=0)            # (9*C, N)

    conv = jnp.dot(wc_ref[...], xstack.astype(wc_ref.dtype),
                   preferred_element_type=jnp.float32)  # (E, N), f32 accumulation
    y = jnp.maximum(conv + bc_ref[...], 0.0)

    # --- global average pool: per-image lane reductions (XLU) ----------------
    # Images are contiguous HW-lane chunks, vreg-aligned when HW % 128 == 0.
    cols = [jnp.sum(y[:, b * HW:(b + 1) * HW], axis=1, keepdims=True)
            for b in range(TB)]
    feat_t = (cols[0] if TB == 1 else jnp.concatenate(cols, axis=1)) * (1.0 / HW)

    # --- classifier, feature-major (no (E, TB) transpose) ---------------------
    h = jnp.maximum(
        jnp.dot(w1_ref[...], feat_t, preferred_element_type=jnp.float32)
        + b1_ref[...], 0.0)                             # (hid, TB)
    logits = (jnp.dot(w2_ref[...], h, preferred_element_type=jnp.float32)
              + b2_ref[...])                            # (out, TB), batch on lanes
    o_ref[...] = logits.astype(o_ref.dtype)[None]       # (1, out, TB) block


# ------------------------------ tiling heuristics ------------------------------
def _step_vmem_bytes(tb, C, HW, E, x_itemsize):
    n = tb * HW
    return (2 * C * n * x_itemsize        # double-buffered input tile
            + 9 * n * 4                   # resident boundary masks
            + 2 * 9 * C * n * 4           # shifted slabs + stacked matmul operand
            + 2 * E * n * 4)              # conv result + ReLU'd activations


def _pick_batch_tile(B, C, HW, E, x_itemsize, vmem_budget_bytes=12 << 20):
    """Largest batch tile that fits the VMEM budget, is BlockSpec-legal, and still
    yields enough grid steps to pipeline and feed both TensorCores."""
    def legal(tb):
        return B % tb == 0 and ((tb * HW) % 128 == 0 or tb == B)

    cands = [tb for tb in range(B, 0, -1) if legal(tb)]          # descending
    fitting = [tb for tb in cands
               if _step_vmem_bytes(tb, C, HW, E, x_itemsize) <= vmem_budget_bytes]
    if not fitting:
        # TODO(synk): very large H*W (e.g. 84x84 MAML images) would need a spatial
        # split of the tile; only the batch axis is tiled here.
        fitting = [cands[-1]]
    for min_steps in (4, 2):     # prefer >= 4 steps (pipelining + 2 TCs), then >= 2
        for tb in fitting:
            if B // tb >= min_steps:
                return tb
    return fitting[0]


# ------------------------------ host wrapper -----------------------------------
def maml_forward(x, params, *, conv_dtype=jnp.float32):
    """Fused Pallas forward. conv_dtype=jnp.bfloat16 enables bf16 MXU operands
    (recommended on v6e/v7x); accumulation and all elementwise work stay f32."""
    wc_flat, bc, w1, b1, w2, b2 = params
    B, C, H, W = x.shape
    HW = H * W
    E = wc_flat.shape[0]
    out_dim = w2.shape[0]

    x_itemsize = jnp.dtype(conv_dtype).itemsize
    TB = _pick_batch_tile(B, C, HW, E, x_itemsize)
    G = B // TB
    N = TB * HW

    # lane-dense layout: (batch*spatial) on the 128-wide lane axis, channels on sublanes
    x_t = jnp.transpose(x, (1, 0, 2, 3)).reshape(C, B * HW).astype(conv_dtype)
    wc = wc_flat.astype(conv_dtype)

    # 3x3 SAME-padding boundary masks for one tile (identical for every grid step)
    n_idx = jnp.arange(N)
    w_pos = n_idx % W
    h_pos = (n_idx // W) % H
    rows = []
    for ki in range(3):
        for kj in range(3):
            hp = h_pos + (ki - 1)
            wp = w_pos + (kj - 1)
            rows.append((hp >= 0) & (hp < H) & (wp >= 0) & (wp < W))
    mask = jnp.stack(rows).astype(jnp.float32)          # (9, N)

    step_bytes = _step_vmem_bytes(TB, C, HW, E, x_itemsize)
    vmem_limit = int(min(64 << 20, max(8 << 20, 2 * step_bytes + (2 << 20))))

    kernel = functools.partial(_maml_fused_kernel, H=H, W=W)

    def resident(a):
        return pl.BlockSpec(a.shape, lambda i: (0,) * a.ndim)

    out = pl.pallas_call(
        kernel,
        out_shape=jax.ShapeDtypeStruct((G, out_dim, TB), jnp.float32),
        grid=(G,),
        in_specs=[
            pl.BlockSpec((C, N), lambda i: (0, i)),     # pipelined input tile
            resident(mask),                             # VMEM-resident masks/weights
            resident(wc), resident(bc),
            resident(w1), resident(b1),
            resident(w2), resident(b2),
        ],
        out_specs=pl.BlockSpec((1, out_dim, TB), lambda i: (i, 0, 0)),
        compiler_params=pltpu.CompilerParams(
            dimension_semantics=("parallel",),
            vmem_limit_bytes=vmem_limit,
        ),
    )(x_t, mask, wc, bc, w1, b1, w2, b2)

    return jnp.transpose(out, (0, 2, 1)).reshape(B, out_dim)


# ------------------------------ reference (JAX) --------------------------------
def maml_forward_ref(x, params):
    wc_flat, bc, w1, b1, w2, b2 = params
    B, C, H, W = x.shape
    E = wc_flat.shape[0]
    wconv = wc_flat.reshape(E, 3, 3, C)                 # (E, ki, kj, c)
    xp = jnp.pad(x, ((0, 0), (0, 0), (1, 1), (1, 1)))
    y = jnp.zeros((B, E, H, W), jnp.float32)
    for ki in range(3):
        for kj in range(3):
            patch = xp[:, :, ki:ki + H, kj:kj + W]      # (B, C, H, W)
            y = y + jnp.einsum("ec,bchw->behw", wconv[:, ki, kj, :], patch)
    y = jnp.maximum(y + bc.reshape(1, E, 1, 1), 0.0)
    feat = jnp.mean(y, axis=(2, 3))                     # (B, E)
    h = jnp.maximum(feat @ w1.T + b1.reshape(1, -1), 0.0)
    return h @ w2.T + b2.reshape(1, -1)


if __name__ == "__main__":
    key = jax.random.PRNGKey(0)
    kx, kx2, kp = jax.random.split(key, 3)

    B, C, H, W = 2, 4, 16, 16
    x = jax.random.normal(kx, (B, C, H, W), dtype=jnp.float32)
    params = init_params(kp, in_ch=C, embed=64, out_size=5)

    # f32 path: exact parity with the reference
    out = jax.block_until_ready(maml_forward(x, params))
    ref = maml_forward_ref(x, params)
    assert out.shape == (B, 5), out.shape
    assert jnp.allclose(out, ref, atol=1e-4, rtol=1e-4), "f32 mismatch vs JAX reference"

    # larger batch: exercises multi-image tiles (TB>1) and the multi-step grid
    B2 = 8
    x2 = jax.random.normal(kx2, (B2, C, H, W), dtype=jnp.float32)
    out2 = jax.block_until_ready(maml_forward(x2, params))
    ref2 = maml_forward_ref(x2, params)
    assert out2.shape == (B2, 5), out2.shape
    assert jnp.allclose(out2, ref2, atol=1e-4, rtol=1e-4), "f32 (B=8) mismatch"

    # bf16 MXU-operand path (v6e/v7x optimization): loose tolerance smoke test
    out_bf16 = jax.block_until_ready(maml_forward(x, params, conv_dtype=jnp.bfloat16))
    assert out_bf16.shape == (B, 5), out_bf16.shape
    assert jnp.allclose(out_bf16, ref, atol=5e-2, rtol=5e-2), "bf16 mismatch"

    print("KERNEL_OK")
</pallas_src>

<mosaic_0001>
module attributes {stable_mosaic.version = 11 : i64} {
  func.func @_maml_fused_kernel(%arg0: i32, %arg1: memref<4x256xf32, #tpu.memory_space<vmem>>, %arg2: memref<9x256xf32, #tpu.memory_space<vmem>>, %arg3: memref<64x36xf32, #tpu.memory_space<vmem>>, %arg4: memref<64x1xf32, #tpu.memory_space<vmem>>, %arg5: memref<32x64xf32, #tpu.memory_space<vmem>>, %arg6: memref<32x1xf32, #tpu.memory_space<vmem>>, %arg7: memref<5x32xf32, #tpu.memory_space<vmem>>, %arg8: memref<5x1xf32, #tpu.memory_space<vmem>>, %arg9: memref<1x5x1xf32, #tpu.memory_space<vmem>>) attributes {dimension_semantics = [#tpu.dimension_semantics<parallel>], iteration_bounds = array<i64: 2>, scalar_prefetch = 0 : i64, scratch_operands = 0 : i64, tpu.core_type = #tpu.core_type<tc>, window_params = [{transform_indices = @transform_0, window_bounds = array<i64: 4, 256>}, {pipeline_mode = #tpu.pipeline_mode<synchronous>, transform_indices = @transform_1, window_bounds = array<i64: 9, 256>}, {pipeline_mode = #tpu.pipeline_mode<synchronous>, transform_indices = @transform_2, window_bounds = array<i64: 64, 36>}, {pipeline_mode = #tpu.pipeline_mode<synchronous>, transform_indices = @transform_3, window_bounds = array<i64: 64, 1>}, {pipeline_mode = #tpu.pipeline_mode<synchronous>, transform_indices = @transform_4, window_bounds = array<i64: 32, 64>}, {pipeline_mode = #tpu.pipeline_mode<synchronous>, transform_indices = @transform_5, window_bounds = array<i64: 32, 1>}, {pipeline_mode = #tpu.pipeline_mode<synchronous>, transform_indices = @transform_6, window_bounds = array<i64: 5, 32>}, {pipeline_mode = #tpu.pipeline_mode<synchronous>, transform_indices = @transform_7, window_bounds = array<i64: 5, 1>}, {transform_indices = @transform_8, window_bounds = array<i64: 1, 5, 1>}]} {
    %c0 = arith.constant 0 : index
    %c0_0 = arith.constant 0 : index
    %0 = vector.load %arg1[%c0, %c0_0] : memref<4x256xf32, #tpu.memory_space<vmem>>, vector<4x256xf32>
    %c17_i32 = arith.constant 17 : i32
    %1 = tpu.dynamic_rotate %0 by %c17_i32 dim 1 : vector<4x256xf32>, i32 -> vector<4x256xf32>
    %c0_1 = arith.constant 0 : index
    %c0_2 = arith.constant 0 : index
    %2 = vector.load %arg2[%c0_1, %c0_2] : memref<9x256xf32, #tpu.memory_space<vmem>>, vector<1x256xf32>
    %3 = vector.broadcast %2 : vector<1x256xf32> to vector<4x256xf32>
    %4 = arith.mulf %1, %3 : vector<4x256xf32>
    %c16_i32 = arith.constant 16 : i32
    %5 = tpu.dynamic_rotate %0 by %c16_i32 dim 1 : vector<4x256xf32>, i32 -> vector<4x256xf32>
    %c1 = arith.constant 1 : index
    %c0_3 = arith.constant 0 : index
    %6 = vector.load %arg2[%c1, %c0_3] : memref<9x256xf32, #tpu.memory_space<vmem>>, vector<1x256xf32>
    %7 = vector.broadcast %6 : vector<1x256xf32> to vector<4x256xf32>
    %8 = arith.mulf %5, %7 : vector<4x256xf32>
    %c15_i32 = arith.constant 15 : i32
    %9 = tpu.dynamic_rotate %0 by %c15_i32 dim 1 : vector<4x256xf32>, i32 -> vector<4x256xf32>
    %c2 = arith.constant 2 : index
    %c0_4 = arith.constant 0 : index
    %10 = vector.load %arg2[%c2, %c0_4] : memref<9x256xf32, #tpu.memory_space<vmem>>, vector<1x256xf32>
    %11 = vector.broadcast %10 : vector<1x256xf32> to vector<4x256xf32>
    %12 = arith.mulf %9, %11 : vector<4x256xf32>
    %c1_i32 = arith.constant 1 : i32
    %13 = tpu.dynamic_rotate %0 by %c1_i32 dim 1 : vector<4x256xf32>, i32 -> vector<4x256xf32>
    %c3 = arith.constant 3 : index
    %c0_5 = arith.constant 0 : index
    %14 = vector.load %arg2[%c3, %c0_5] : memref<9x256xf32, #tpu.memory_space<vmem>>, vector<1x256xf32>
    %15 = vector.broadcast %14 : vector<1x256xf32> to vector<4x256xf32>
    %16 = arith.mulf %13, %15 : vector<4x256xf32>
    %c4 = arith.constant 4 : index
    %c0_6 = arith.constant 0 : index
    %17 = vector.load %arg2[%c4, %c0_6] : memref<9x256xf32, #tpu.memory_space<vmem>>, vector<1x256xf32>
    %18 = vector.broadcast %17 : vector<1x256xf32> to vector<4x256xf32>
    %19 = arith.mulf %0, %18 : vector<4x256xf32>
    %c255_i32 = arith.constant 255 : i32
    %20 = tpu.dynamic_rotate %0 by %c255_i32 dim 1 : vector<4x256xf32>, i32 -> vector<4x256xf32>
    %c5 = arith.constant 5 : index
    %c0_7 = arith.constant 0 : index
    %21 = vector.load %arg2[%c5, %c0_7] : memref<9x256xf32, #tpu.memory_space<vmem>>, vector<1x256xf32>
    %22 = vector.broadcast %21 : vector<1x256xf32> to vector<4x256xf32>
    %23 = arith.mulf %20, %22 : vector<4x256xf32>
    %c241_i32 = arith.constant 241 : i32
    %24 = tpu.dynamic_rotate %0 by %c241_i32 dim 1 : vector<4x256xf32>, i32 -> vector<4x256xf32>
    %c6 = arith.constant 6 : index
    %c0_8 = arith.constant 0 : index
    %25 = vector.load %arg2[%c6, %c0_8] : memref<9x256xf32, #tpu.memory_space<vmem>>, vector<1x256xf32>
    %26 = vector.broadcast %25 : vector<1x256xf32> to vector<4x256xf32>
    %27 = arith.mulf %24, %26 : vector<4x256xf32>
    %c240_i32 = arith.constant 240 : i32
    %28 = tpu.dynamic_rotate %0 by %c240_i32 dim 1 : vector<4x256xf32>, i32 -> vector<4x256xf32>
    %c7 = arith.constant 7 : index
    %c0_9 = arith.constant 0 : index
    %29 = vector.load %arg2[%c7, %c0_9] : memref<9x256xf32, #tpu.memory_space<vmem>>, vector<1x256xf32>
    %30 = vector.broadcast %29 : vector<1x256xf32> to vector<4x256xf32>
    %31 = arith.mulf %28, %30 : vector<4x256xf32>
    %c239_i32 = arith.constant 239 : i32
    %32 = tpu.dynamic_rotate %0 by %c239_i32 dim 1 : vector<4x256xf32>, i32 -> vector<4x256xf32>
    %c8 = arith.constant 8 : index
    %c0_10 = arith.constant 0 : index
    %33 = vector.load %arg2[%c8, %c0_10] : memref<9x256xf32, #tpu.memory_space<vmem>>, vector<1x256xf32>
    %34 = vector.broadcast %33 : vector<1x256xf32> to vector<4x256xf32>
    %35 = arith.mulf %32, %34 : vector<4x256xf32>
    %36 = tpu.concatenate %4, %8, %12, %16, %19, %23, %27, %31, %35 in 0 : vector<4x256xf32>, vector<4x256xf32>, vector<4x256xf32>, vector<4x256xf32>, vector<4x256xf32>, vector<4x256xf32>, vector<4x256xf32>, vector<4x256xf32>, vector<4x256xf32> -> vector<36x256xf32>
    %c0_11 = arith.constant 0 : index
    %c0_12 = arith.constant 0 : index
    %37 = vector.load %arg3[%c0_11, %c0_12] : memref<64x36xf32, #tpu.memory_space<vmem>>, vector<64x36xf32>
    %cst = arith.constant dense<0.000000e+00> : vector<64x256xf32>
    %38 = tpu.matmul %37, %36, %cst {dimension_numbers = #tpu.dot_dimension_numbers<[1], [0], [0], [1], [0, 0, 1, 1], [], []>} : vector<64x36xf32>, vector<36x256xf32>, vector<64x256xf32> -> vector<64x256xf32>
    %c0_13 = arith.constant 0 : index
    %c0_14 = arith.constant 0 : index
    %39 = vector.load %arg4[%c0_13, %c0_14] : memref<64x1xf32, #tpu.memory_space<vmem>>, vector<64x1xf32>
    %40 = vector.broadcast %39 : vector<64x1xf32> to vector<64x256xf32>
    %41 = arith.addf %38, %40 : vector<64x256xf32>
    %cst_15 = arith.constant 0.000000e+00 : f32
    %42 = vector.broadcast %cst_15 : f32 to vector<64x256xf32>
    %43 = arith.maximumf %41, %42 : vector<64x256xf32>
    %cst_16 = arith.constant dense<0.000000e+00> : vector<64xf32>
    %44 = vector.multi_reduction <add>, %43, %cst_16 [1] : vector<64x256xf32> to vector<64xf32>
    %45 = vector.shape_cast %44 : vector<64xf32> to vector<64x1xf32>
    %cst_17 = arith.constant 3.906250e-03 : f32
    %46 = vector.broadcast %cst_17 : f32 to vector<64x1xf32>
    %47 = arith.mulf %45, %46 : vector<64x1xf32>
    %c0_18 = arith.constant 0 : index
    %c0_19 = arith.constant 0 : index
    %48 = vector.load %arg5[%c0_18, %c0_19] : memref<32x64xf32, #tpu.memory_space<vmem>>, vector<32x64xf32>
    %cst_20 = arith.constant dense<0.000000e+00> : vector<32x1xf32>
    %49 = tpu.matmul %48, %47, %cst_20 {dimension_numbers = #tpu.dot_dimension_numbers<[1], [0], [0], [1], [0, 0, 1, 1], [], []>} : vector<32x64xf32>, vector<64x1xf32>, vector<32x1xf32> -> vector<32x1xf32>
    %c0_21 = arith.constant 0 : index
    %c0_22 = arith.constant 0 : index
    %50 = vector.load %arg6[%c0_21, %c0_22] : memref<32x1xf32, #tpu.memory_space<vmem>>, vector<32x1xf32>
    %51 = arith.addf %49, %50 : vector<32x1xf32>
    %cst_23 = arith.constant 0.000000e+00 : f32
    %52 = vector.broadcast %cst_23 : f32 to vector<32x1xf32>
    %53 = arith.maximumf %51, %52 : vector<32x1xf32>
    %c0_24 = arith.constant 0 : index
    %c0_25 = arith.constant 0 : index
    %54 = vector.load %arg7[%c0_24, %c0_25] : memref<5x32xf32, #tpu.memory_space<vmem>>, vector<5x32xf32>
    %cst_26 = arith.constant dense<0.000000e+00> : vector<5x1xf32>
    %55 = tpu.matmul %54, %53, %cst_26 {dimension_numbers = #tpu.dot_dimension_numbers<[1], [0], [0], [1], [0, 0, 1, 1], [], []>} : vector<5x32xf32>, vector<32x1xf32>, vector<5x1xf32> -> vector<5x1xf32>
    %c0_27 = arith.constant 0 : index
    %c0_28 = arith.constant 0 : index
    %56 = vector.load %arg8[%c0_27, %c0_28] : memref<5x1xf32, #tpu.memory_space<vmem>>, vector<5x1xf32>
    %57 = arith.addf %55, %56 : vector<5x1xf32>
    %58 = vector.shape_cast %57 : vector<5x1xf32> to vector<1x5x1xf32>
    %c0_29 = arith.constant 0 : index
    %c0_30 = arith.constant 0 : index
    %c0_31 = arith.constant 0 : index
    %59 = vector.load %arg9[%c0_29, %c0_30, %c0_31] : memref<1x5x1xf32, #tpu.memory_space<vmem>>, vector<1x5x1xf32>
    tpu.vector_store %arg9[%c0_29, %c0_30, %c0_31], %58 {strides = array<i32>} : memref<1x5x1xf32, #tpu.memory_space<vmem>>, vector<1x5x1xf32>,
    return
  }
  func.func @transform_0(%arg0: i32) -> (i32, i32) {
    %c0_i32 = arith.constant 0 : i32
    %c0_i32_0 = arith.constant 0 : i32
    return %c0_i32, %arg0 : i32, i32
  }
  func.func @transform_1(%arg0: i32) -> (i32, i32) {
    %c0_i32 = arith.constant 0 : i32
    %c0_i32_0 = arith.constant 0 : i32
    %c0_i32_1 = arith.constant 0 : i32
    return %c0_i32, %c0_i32_0 : i32, i32
  }
  func.func @transform_2(%arg0: i32) -> (i32, i32) {
    %c0_i32 = arith.constant 0 : i32
    %c0_i32_0 = arith.constant 0 : i32
    %c0_i32_1 = arith.constant 0 : i32
    return %c0_i32, %c0_i32_0 : i32, i32
  }
  func.func @transform_3(%arg0: i32) -> (i32, i32) {
    %c0_i32 = arith.constant 0 : i32
    %c0_i32_0 = arith.constant 0 : i32
    %c0_i32_1 = arith.constant 0 : i32
    return %c0_i32, %c0_i32_0 : i32, i32
  }
  func.func @transform_4(%arg0: i32) -> (i32, i32) {
    %c0_i32 = arith.constant 0 : i32
    %c0_i32_0 = arith.constant 0 : i32
    %c0_i32_1 = arith.constant 0 : i32
    return %c0_i32, %c0_i32_0 : i32, i32
  }
  func.func @transform_5(%arg0: i32) -> (i32, i32) {
    %c0_i32 = arith.constant 0 : i32
    %c0_i32_0 = arith.constant 0 : i32
    %c0_i32_1 = arith.constant 0 : i32
    return %c0_i32, %c0_i32_0 : i32, i32
  }
  func.func @transform_6(%arg0: i32) -> (i32, i32) {
    %c0_i32 = arith.constant 0 : i32
    %c0_i32_0 = arith.constant 0 : i32
    %c0_i32_1 = arith.constant 0 : i32
    return %c0_i32, %c0_i32_0 : i32, i32
  }
  func.func @transform_7(%arg0: i32) -> (i32, i32) {
    %c0_i32 = arith.constant 0 : i32
    %c0_i32_0 = arith.constant 0 : i32
    %c0_i32_1 = arith.constant 0 : i32
    return %c0_i32, %c0_i32_0 : i32, i32
  }
  func.func @transform_8(%arg0: i32) -> (i32, i32, i32) {
    %c0_i32 = arith.constant 0 : i32
    %c0_i32_0 = arith.constant 0 : i32
    %c0_i32_1 = arith.constant 0 : i32
    return %arg0, %c0_i32, %c0_i32_0 : i32, i32, i32
  }
}

</mosaic_0001>

<bundles_post_ra>
// kernel: tpu_custom_call.1
= control target key start
LH: loop header
LB: loop body
LE: loop exit
PB: predicated region body
PF: predicated region fallthrough
CT: control target
= control target key end

     0   :  { %s1010_s27 = smov 0   ;;  %s1224_s0 = inlined_call_operand.vmem [shape: f32[4,512], index: 0, kind: input, shape index: {}]   ;;  %s1225_s1 = inlined_call_operand.vmem [shape: f32[9,256], index: 1, kind: input, shape index: {}]   ;;  %s1226_s2 = inlined_call_operand.vmem [shape: f32[64,36], index: 2, kind: input, shape index: {}]   ;;  %s1227_s3 = inlined_call_operand.vmem [shape: f32[64,1], index: 3, kind: input, shape index: {}]   ;;  %s1228_s4 = inlined_call_operand.vmem [shape: f32[32,64], index: 4, kind: input, shape index: {}]   ;;  %s1229_s5 = inlined_call_operand.vmem [shape: f32[32,1], index: 5, kind: input, shape index: {}]   ;;  %s1230_s6 = inlined_call_operand.vmem [shape: f32[5,32], index: 6, kind: input, shape index: {}]   ;;  %s1231_s7 = inlined_call_operand.vmem [shape: f32[5,1], index: 7, kind: input, shape index: {}]   ;;  %s1232_s8 = inlined_call_operand.vmem [shape: f32[2,5,1], index: 8, kind: output, shape index: {}]  }
   0x1 LB: > { %s1016_s28 = sadd.s32 4294967295, %s954_s27   ;;  %p881_p0 = scmp.ge.s32.totalorder %s954_s27, 1  ;;  %s954_s27 = sphi %s1010_s27, %s18_s27  }
   0x2   : > { %p263_p1 = scmp.lt.s32.totalorder %s954_s27, 3 }
   0x4   : > { %p264_p2 = pnand %p881_p0, %p263_p1 }
   0x5   : > { %s882_s29 = sshll.u32 (!%p264_p2), %s1016_s28, 1  ;;  %s956_s12 = smov (!%p264_p2), 16  }
   0x6   : > { %267 = sbr.rel (%p264_p2) target bundleno = 821 (0x335), region = 52  ;;  %p297_p3 = scmp.lt.s32.totalorder (!%p264_p2), %s882_s29, 3 }
   0x7   : > { %s957_s13 = smov (!%p264_p2), 15   ;;  %s958_s14 = smov (!%p264_p2), 1  }
   0x8   : > { %s959_s15 = smov (!%p264_p2), 127   ;;  %s960_s16 = smov (!%p264_p2), 113  }
   0x9   : > { %s961_s17 = smov (!%p264_p2), 112   ;;  %s962_s18 = smov (!%p264_p2), 17  }
   0xa   : > { %s963_s19 = smov (!%p264_p2), 111   ;;  %p302_p4 = scmp.lt.s32.totalorder (!%p264_p2), %s1016_s28, 1 }
   0xb   : > { %s1234_s29 = smov (!%p297_p3, %s882_s29), 3  ;;  %v888_v17 = vld [vmem:[%s1225_s1 + $0x4] ss:$8 sm:$0x3]  ;;  %vm399_vm0 = vcmask 1043456   ;;  %v317_v32 = vlaneseq  ;;  %v964_v33 = vmov 0  }
   0xc   : > { %s883_s30 = sshll.u32 %s1234_s29, 2  ;;  %v396_v18 = vperm.slane %v888_v17, 0  ;;  %v397_v19 = vperm.slane %v888_v17, 1  ;;  %947 = vset.pattern.permute.xlu0 %v964_v33  ;;  %945 = vset.pattern.permute.xlu1 %v964_v33  ;;  %v538_v34 = vld [vmem:[%s1227_s3 + $0x28] sm:$0xff]  ;;  %v533_v46 = vld [vmem:[%s1227_s3] sm:$0xff]  ;;  %v540_v47 = vld [vmem:[%s1227_s3 + $0x38] sm:$0xff] }
   0xd   : > { %s300_s11 = scalar_lea.vmem %s1224_s0, %s883_s30  ;;  %946 = vset.pattern.permute.xlu2 %v964_v33  ;;  %v1039_v35 = vand.u32 127, %v317_v32  ;;  %v891_v36 = vld [vmem:[%s1225_s1 + $0x7] ss:$8 sm:$0x3]  ;;  %vm581_vm9 = vcmask 293888   ;;  %vm750_vm10 = vcmask 523264  }
   0xe   : > { %v306_v0 = vld [vmem:[%s300_s11] sm:$0xff]  ;;  %v398_v21 = vrot.slane %v397_v19, 4  ;;  %v460_v42 = vperm.slane %v891_v36, 0  ;;  %v461_v44 = vperm.slane %v891_v36, 1  ;;  %vm798_vm11 = vcmask 261120   ;;  %s1236_s28 = smov (!%p302_p4, %s1016_s28), 1 }
   0xf   : > { %308 = vst [vmem:[#allocation1] ss:$2 sm:$0xff] %v306_v0  ;;  %vm454_vm1 = vcmp.lt.s32.totalorder %v1039_v35, 112  ;;  %v1048_v37 = vld [vmem:[%s1225_s1 + $0x1] ss:$8 sm:$0x3] }
  0x10   : > { %v400_v22 = vsel %vm399_vm0, %v396_v18, %v398_v21  ;;  %v889_v38 = vld [vmem:[%s1225_s1 + $0x5] ss:$8 sm:$0x3]  ;;  %v887_v41 = vld [vmem:[%s1225_s1 + $0x3] ss:$8 sm:$0x3] }
  0x11   : > { %v402_v23 = vmul.f32 %v400_v22, %v306_v0  ;;  %vm412_vm2 = vcmp.lt.s32.totalorder %v1039_v35, 127  ;;  %v418_v48 = vperm.slane %v889_v38, 0  ;;  %v892_v50 = vld [vmem:[%s1225_s1 + $0x10] ss:$8 sm:$0x3]  ;;  %v345_v51 = vperm.slane %v1048_v37, 0 }
  0x12   : > { %v387_v52 = vperm.slane %v887_v41, 0  ;;  %v890_v53 = vld [vmem:[%s1225_s1 + $0x6] ss:$8 sm:$0x3]  ;;  %v419_v54 = vperm.slane %v889_v38, 1  ;;  %vm381_vm3 = vcmp.lt.s32.totalorder %v1039_v35, 1 }
  0x13   : > { %vm433_vm4 = vcmp.lt.s32.totalorder %v1039_v35, 113  ;;  %vm475_vm5 = vcmp.lt.s32.totalorder %v1039_v35, 111  ;;  %v481_v59 = vperm.slane %v892_v50, 0  ;;  %v482_v60 = vperm.slane %v892_v50, 1  ;;  %s884_s30 = sshll.u32 %s1236_s28, 3 }
  0x14   : > { %vm339_vm6 = vcmp.lt.s32.totalorder %v1039_v35, 16  ;;  %v388_v61 = vperm.slane %v887_v41, 1  ;;  %v439_v62 = vperm.slane %v890_v53, 0  ;;  %v886_v19 = vld [vmem:[%s1225_s1 + $0x2] ss:$8 sm:$0x3] }
  0x15   : > { %vm319_vm7 = vcmp.lt.s32.totalorder %v1039_v35, 17  ;;  %vm360_vm8 = vcmp.lt.s32.totalorder %v1039_v35, 15  ;;  %v366_v33 = vperm.slane %v886_v19, 0  ;;  %vm822_vm12 = vcmask 4096  }
  0x16   : > { %v309_v1 = vld.sshfl [vmem:[#allocation1] sm:$0xff pattern:$0x75316420]  ;;  %v310_v2 = vld.sshfl [vmem:[#allocation1 + $0x8] sm:$0xff pattern:$0x75316420] }
  0x17   : > { %330 = vst [vmem:[#allocation1] ss:$2 sm:$0xff] %v306_v0 }
  0x1e   : > { %v331_v3 = vld.sshfl [vmem:[#allocation1] sm:$0xff pattern:$0x75316420]  ;;  %v332_v4 = vld.sshfl [vmem:[#allocation1 + $0x8] sm:$0xff pattern:$0x75316420] }
  0x1f   : > { %351 = vst [vmem:[#allocation1] ss:$2 sm:$0xff] %v306_v0  ;;  %335 = vrot.lane.b32.xlu1 %v331_v3, %s956_s12  ;;  %337 = vrot.lane.b32.xlu2 %v332_v4, %s956_s12 }
  0x26   : > { %v352_v5 = vld.sshfl [vmem:[#allocation1] sm:$0xff pattern:$0x75316420]  ;;  %v353_v6 = vld.sshfl [vmem:[#allocation1 + $0x8] sm:$0xff pattern:$0x75316420] }
  0x27   : > { %356 = vrot.lane.b32.xlu0 %v352_v5, %s957_s13  ;;  %372 = vst [vmem:[#allocation1] ss:$2 sm:$0xff] %v306_v0 }
  0x2e   : > { %v374_v7 = vld.sshfl [vmem:[#allocation1 + $0x8] sm:$0xff pattern:$0x75316420]  ;;  %v373_v8 = vld.sshfl [vmem:[#allocation1] sm:$0xff pattern:$0x75316420] }
  0x2f   : > { %379 = vrot.lane.b32.xlu0 %v374_v7, %s958_s14  ;;  %403 = vst [vmem:[#allocation1] ss:$2 sm:$0xff] %v306_v0  ;;  %377 = vrot.lane.b32.xlu2 %v373_v8, %s958_s14 }
  0x36   : > { %v404_v9 = vld.sshfl [vmem:[#allocation1] sm:$0xff pattern:$0x75316420]  ;;  %v405_v10 = vld.sshfl [vmem:[#allocation1 + $0x8] sm:$0xff pattern:$0x75316420] }
  0x37   : > { %424 = vst [vmem:[#allocation1] ss:$2 sm:$0xff] %v306_v0  ;;  %408 = vrot.lane.b32.xlu2 %v404_v9, %s959_s15  ;;  %v537_v9 = vld [vmem:[%s1227_s3 + $0x20] sm:$0xff] }
  0x3e   : > { %v425_v11 = vld.sshfl [vmem:[#allocation1] sm:$0xff pattern:$0x75316420]  ;;  %v426_v12 = vld.sshfl [vmem:[#allocation1 + $0x8] sm:$0xff pattern:$0x75316420] }
  0x3f   : > { %429 = vrot.lane.b32.xlu0 %v425_v11, %s960_s16  ;;  %431 = vrot.lane.b32.xlu1 %v426_v12, %s960_s16  ;;  %445 = vst [vmem:[#allocation1] ss:$2 sm:$0xff] %v306_v0  ;;  %v322_v12 = vld [vmem:[%s1225_s1] ss:$8 sm:$0x3] }
  0x40   : > { %410 = vrot.lane.b32.xlu2 %v405_v10, %s959_s15  ;;  %v325_v36 = vperm.slane %v322_v12, 1 }
  0x46   : > { %v446_v13 = vld.sshfl [vmem:[#allocation1] sm:$0xff pattern:$0x75316420]  ;;  %v447_v14 = vld.sshfl [vmem:[#allocation1 + $0x8] sm:$0xff pattern:$0x75316420] }
  0x47   : > { %450 = vrot.lane.b32.xlu0 %v446_v13, %s961_s17  ;;  %466 = vst [vmem:[#allocation1] ss:$2 sm:$0xff] %v306_v0 }
  0x48   : > { %313 = vrot.lane.b32.xlu2 %v309_v1, %s962_s18  ;;  %v440_v1 = vperm.slane %v890_v53, 1 }
  0x4e   : > { %v467_v15 = vld.sshfl [vmem:[#allocation1] sm:$0xff pattern:$0x75316420]  ;;  %v468_v16 = vld.sshfl [vmem:[#allocation1 + $0x8] sm:$0xff pattern:$0x75316420] }
  0x4f   : > { %452 = vrot.lane.b32.xlu0 %v447_v14, %s961_s17  ;;  %471 = vrot.lane.b32.xlu1 %v467_v15, %s963_s19  ;;  %500 = vst [vmem:[#allocation1] ss:$2 sm:$0xff] %v402_v23  ;;  %v346_v15 = vperm.slane %v1048_v37, 1  ;;  %v539_v37 = vld [vmem:[%s1227_s3 + $0x30] sm:$0xff] }
  0x50   : > { %573 = vperm.xlu2 %946, %v539_v37  }
  0x57   : > { %315 = vrot.lane.b32.xlu0 %v310_v2, %s962_s18  ;;  %473 = vrot.lane.b32.xlu1 %v468_v16, %s963_s19 }
  0x5f   : > { %358 = vrot.lane.b32.xlu1 %v353_v6, %s957_s13  ;;  %568 = vperm.xlu0 %947, %v538_v34   ;;  %v367_v34 = vperm.slane %v886_v19, 1  ;;  %s305_s13 = scalar_lea.vmem %s1232_s8, %s884_s30 }
  0x67   : > { %578 = vperm.xlu1 %945, %v540_v47   ;;  %543 = vperm.xlu0 %947, %v533_v46  }
  0x6f   : > { %563 = vperm.xlu1 %945, %v537_v9  }
  0x79   : > { %v1032_v24 = vpop.permute.xlu2 %337 }
  0x89   : > { %v378_v27 = vpop.permute.xlu2 %377 }
  0x91   : > { %v1034_v26 = vpop.permute.xlu1 %335  ;;  %v409_v30 = vpop.permute.xlu2 %408 }
  0x92   : > { %v340_v16 = vsel %vm339_vm6, %v1034_v26, %v1032_v24  ;;  %v341_v21 = vsel %vm339_vm6, %v1032_v24, %v1034_v26  ;;  %v502_v24 = vld.sshfl [vmem:[#allocation1 + $0x8] sm:$0xff pattern:$0x75316420] }
  0x99   : > { %v1029_v20 = vpop.permute.xlu0 %356 }
  0x9a   : > { %v411_v43 = vpop.permute.xlu2 %410 }
  0x9b   : > { %v413_v55 = vsel %vm412_vm2, %v409_v30, %v411_v43  ;;  %v414_v56 = vsel %vm412_vm2, %v411_v43, %v409_v30 }
  0x9c   : > { %v422_v63 = vmul.f32 %v418_v48, %v413_v55  ;;  %v423_v3 = vmul.f32 %v419_v54, %v414_v56  ;;  %v535_v48 = vld [vmem:[%s1227_s3 + $0x10] sm:$0xff]  ;;  %v525_v56 = vld [vmem:[%s1226_s2] sm:$0xff] }
  0x9d   : > { %553 = vperm.xlu1 %945, %v535_v48  }
  0x9e   : > { %v507_v18 = vrot.slane %v422_v63, 4  ;;  %v508_v23 = vrot.slane %v423_v3, 4  ;;  %v534_v63 = vld [vmem:[%s1227_s3 + $0x8] sm:$0xff] }
  0x9f   : > { %v530_v3 = vld [vmem:[%s1226_s2 + $0x28] sm:$0xff] }
  0xa0   : > { %v522_v43 = vsel %vm399_vm0, %v502_v24, %v508_v23 }
  0xa1   : > { %v380_v25 = vpop.permute.xlu0 %379 }
  0xa2   : > { %v382_v0 = vsel %vm381_vm3, %v378_v27, %v380_v25  ;;  %v383_v10 = vsel %vm381_vm3, %v380_v25, %v378_v27  ;;  %v314_v25 = vpop.permute.xlu2 %313 }
  0xa3   : > { %v392_v30 = vmul.f32 %v388_v61, %v382_v0  ;;  %v526_v61 = vld [vmem:[%s1226_s2 + $0x8] sm:$0xff]  ;;  %v527_v0 = vld [vmem:[%s1226_s2 + $0x10] sm:$0xff] }
  0xb1   : > { %v430_v28 = vpop.permute.xlu0 %429  ;;  %v432_v29 = vpop.permute.xlu1 %431 }
  0xb2   : > { %v434_v2 = vsel %vm433_vm4, %v430_v28, %v432_v29  ;;  %v435_v5 = vsel %vm433_vm4, %v432_v29, %v430_v28  ;;  %v501_v28 = vld.sshfl [vmem:[#allocation1] sm:$0xff pattern:$0x75316420]  ;;  %v391_v29 = vmul.f32 %v387_v52, %v383_v10 }
  0xb3   : > { %v443_v17 = vmul.f32 %v439_v62, %v434_v2  ;;  %v444_v22 = vmul.f32 %v440_v1, %v435_v5  ;;  %v532_v62 = vld [vmem:[%s1226_s2 + $0x38] sm:$0xff]  ;;  %v529_v2 = vld [vmem:[%s1226_s2 + $0x20] sm:$0xff] }
  0xb4   : > { %v528_v1 = vld [vmem:[%s1226_s2 + $0x18] sm:$0xff] }
  0xb9   : > { %v451_v31 = vpop.permute.xlu0 %450 }
  0xc1   : > { %v453_v39 = vpop.permute.xlu0 %452  ;;  %v472_v40 = vpop.permute.xlu1 %471 }
  0xc2   : > { %v455_v45 = vsel %vm454_vm1, %v451_v31, %v453_v39  ;;  %v456_v49 = vsel %vm454_vm1, %v453_v39, %v451_v31  ;;  %v324_v31 = vperm.slane %v322_v12, 0  ;;  %v521_v39 = vsel %vm399_vm0, %v501_v28, %v507_v18 }
  0xc3   : > { %v464_v57 = vmul.f32 %v460_v42, %v455_v45  ;;  %v465_v58 = vmul.f32 %v461_v44, %v456_v49  ;;  %v350_v44 = vmul.f32 %v346_v15, %v340_v16  ;;  %v495_v45 = vrot.slane %v391_v29, 4 }
  0xc4   : > { %v496_v49 = vrot.slane %v392_v30, 4 }
  0xc5   : > { %v513_v6 = vrot.slane %v464_v57, 4  ;;  %v514_v11 = vrot.slane %v465_v58, 4  ;;  %v490_v55 = vrot.slane %v350_v44, 4  ;;  %v531_v58 = vld [vmem:[%s1226_s2 + $0x30] sm:$0xff] }
  0xc7   : > { %v523_v32 = vsel %vm399_vm0, %v443_v17, %v513_v6  ;;  %v524_v26 = vsel %vm399_vm0, %v444_v22, %v514_v11 }
  0xc9   : > { %v474_v4 = vpop.permute.xlu1 %473  ;;  %v316_v27 = vpop.permute.xlu0 %315 }
  0xca   : > { %v476_v7 = vsel %vm475_vm5, %v472_v40, %v474_v4  ;;  %v477_v8 = vsel %vm475_vm5, %v474_v4, %v472_v40  ;;  %v321_v38 = vsel %vm319_vm7, %v316_v27, %v314_v25  ;;  %v349_v40 = vmul.f32 %v345_v51, %v341_v21 }
  0xcb   : > { %v485_v13 = vmul.f32 %v481_v59, %v476_v7  ;;  %v1092_v14 = vmul.f32 %v482_v60, %v477_v8  ;;  %v320_v41 = vsel %vm319_vm7, %v314_v25, %v316_v27  ;;  %v328_v50 = vmul.f32 %v324_v31, %v321_v38  ;;  %v536_v60 = vld [vmem:[%s1227_s3 + $0x18] sm:$0xff] }
  0xcc   : > { %v329_v53 = vmul.f32 %v325_v36, %v320_v41  ;;  %v489_v54 = vrot.slane %v349_v40, 4  ;;  %558 = vperm.xlu2 %946, %v536_v60  }
  0xcd   : > { %893 = vmatpush.msk.msra.mxu0 %vm399_vm0, %v485_v13  ;;  %918 = vmatpush.msk.msra.mxu3 %vm399_vm0, %v485_v13  ;;  %v574_v13 = vpop.permute.xlu2 %573 }
  0xce   : > { %902 = vmatpush.msk.msra.mxu1 %vm399_vm0, %v1092_v14  ;;  %v517_v57 = vsel %vm399_vm0, %v328_v50, %v489_v54  ;;  %v518_v59 = vsel %vm399_vm0, %v329_v53, %v490_v55 }
  0xcf   : > { %624 = vmatpush.msra.mxu0 %v523_v32  ;;  %919 = vmatpush.msra.mxu3 %v523_v32 }
  0xd0   : > { %665 = vmatpush.msra.mxu1 %v524_v26 }
  0xd1   : > { %v359_v42 = vpop.permute.xlu1 %358  ;;  %625 = vmatpush.msra.mxu0 %v521_v39  ;;  %920 = vmatpush.msra.mxu3 %v521_v39  ;;  %v569_v27 = vpop.permute.xlu0 %568 }
  0xd2   : > { %v361_v46 = vsel %vm360_vm8, %v1029_v20, %v359_v42  ;;  %v362_v47 = vsel %vm360_vm8, %v359_v42, %v1029_v20  ;;  %666 = vmatpush.msra.mxu1 %v522_v43 }
  0xd3   : > { %v370_v51 = vmul.f32 %v366_v33, %v362_v47  ;;  %v371_v52 = vmul.f32 %v367_v34, %v361_v46 }
  0xd4   : > { %548 = vperm.xlu2 %946, %v534_v63  }
  0xd5   : > { %v519_v35 = vsel %vm399_vm0, %v370_v51, %v495_v45  ;;  %v520_v20 = vsel %vm399_vm0, %v371_v52, %v496_v49 }
  0xd6   : > { %626 = vmatpush.msra.mxu0 %v519_v35  ;;  %921 = vmatpush.msra.mxu3 %v519_v35 }
  0xd7   : > { %667 = vmatpush.msra.mxu1 %v520_v20 }
  0xd8   : > { %627 = vmatpush.msra.mxu0 %v517_v57  ;;  %922 = vmatpush.msra.mxu3 %v517_v57 }
  0xd9   : > { %668 = vmatpush.msra.mxu1 %v518_v59  ;;  %894 = vmatmul.msk.f32.vlgmr.msra.gmra.mxu0 %vm581_vm9, %v525_v56  ;;  %v579_v9 = vpop.permute.xlu1 %578  ;;  %v544_v48 = vpop.permute.xlu0 %543 }
  0xda   : > { %900 = vmatmul.msk.f32.vlgmr.msra.gmra.mxu3 %vm581_vm9, %v531_v58  ;;  %903 = vmatmul.msk.f32.vlgmr.msra.gmra.mxu1 %vm581_vm9, %v525_v56 }
  0xdb   : > { %923 = vmatpush.msk.msrb.mxu3 %vm399_vm0, %v1092_v14 }
  0xdd   : > { %924 = vmatpush.msrb.mxu3 %v524_v26 }
  0xdf   : > { %925 = vmatpush.msrb.mxu3 %v522_v43 }
  0xe1   : > { %926 = vmatpush.msrb.mxu3 %v520_v20  ;;  %895 = vmatmul.msk.f32.gmra.mxu0 %vm581_vm9, %v526_v61  ;;  %v564_v18 = vpop.permute.xlu1 %563 }
  0xe2   : > { %901 = vmatmul.msk.f32.gmra.mxu3 %vm581_vm9, %v532_v62  ;;  %904 = vmatmul.msk.f32.gmra.mxu1 %vm581_vm9, %v526_v61 }
  0xe3   : > { %927 = vmatpush.msrb.mxu3 %v518_v59 }
  0xe9   : > { %896 = vmatmul.msk.f32.gmra.mxu0 %vm581_vm9, %v527_v0 }
  0xea   : > { %905 = vmatmul.msk.f32.gmra.mxu1 %vm581_vm9, %v527_v0  ;;  %909 = vmatmul.msk.f32.vlgmr.msrb.gmra.mxu3 %vm581_vm9, %v531_v58 }
  0xf1   : > { %897 = vmatmul.msk.f32.gmra.mxu0 %vm581_vm9, %v528_v1 }
  0xf2   : > { %906 = vmatmul.msk.f32.gmra.mxu1 %vm581_vm9, %v528_v1  ;;  %910 = vmatmul.msk.f32.gmra.mxu3 %vm581_vm9, %v532_v62 }
  0xf9   : > { %898 = vmatmul.msk.f32.gmra.mxu0 %vm581_vm9, %v529_v2 }
  0xfa   : > { %907 = vmatmul.msk.f32.gmra.mxu1 %vm581_vm9, %v529_v2 }
 0x101   : > { %899 = vmatmul.msk.f32.gmra.mxu0 %vm581_vm9, %v530_v3 }
 0x102   : > { %908 = vmatmul.msk.f32.gmra.mxu1 %vm581_vm9, %v530_v3 }
 0x10f   : > { %v554_v36 = vpop.permute.xlu1 %553 }
 0x126   : > { %v559_v31 = vpop.permute.xlu2 %558 }
 0x12e   : > { %v549_v54 = vpop.permute.xlu2 %548 }
 0x156   : > { %v629_v4 = vpop.f32.mrf.mxu0 }
 0x157   : > { %v670_v5 = vpop.f32.mrf.mxu1  ;;  %v630_v20 = vadd.f32 %v629_v4, %v544_v48 }
 0x158   : > { %v671_v55 = vadd.f32 %v670_v5, %v544_v48 }
 0x159   : > { %v694_v62 = vmax.f32 %v630_v20, 0.0 }
 0x15a   : > { %v695_v63 = vmax.f32 %v671_v55, 0.0 }
 0x15c   : > { %v710_v2 = vadd.f32 %v695_v63, %v694_v62 }
 0x15d   : > { %v647_v6 = vpop.f32.mrf.mxu3 }
 0x15e   : > { %v632_v7 = vpop.f32.mrf.mxu0  ;;  %v648_v14 = vadd.f32 %v647_v6, %v574_v13 }
 0x15f   : > { %v673_v8 = vpop.f32.mrf.mxu1  ;;  %v633_v58 = vadd.f32 %v632_v7, %v549_v54 }
 0x160   : > { %v706_v21 = vmax.f32 %v648_v14, 0.0  ;;  %v674_v59 = vadd.f32 %v673_v8, %v549_v54 }
 0x161   : > { %v696_v0 = vmax.f32 %v633_v58, 0.0 }
 0x162   : > { %v697_v1 = vmax.f32 %v674_v59, 0.0 }
 0x164   : > { %v713_v3 = vadd.f32 %v697_v1, %v696_v0 }
 0x165   : > { %v650_v10 = vpop.f32.mrf.mxu3 }
 0x166   : > { %v635_v11 = vpop.f32.mrf.mxu0  ;;  %v651_v25 = vadd.f32 %v650_v10, %v579_v9 }
 0x167   : > { %v676_v12 = vpop.f32.mrf.mxu1  ;;  %v636_v43 = vadd.f32 %v635_v11, %v554_v36 }
 0x168   : > { %v708_v26 = vmax.f32 %v651_v25, 0.0  ;;  %v677_v44 = vadd.f32 %v676_v12, %v554_v36  ;;  %v745_v25 = vld [vmem:[%s1228_s4 + $0x18] sm:$0xff] }
 0x169   : > { %v698_v51 = vmax.f32 %v636_v43, 0.0  ;;  %v796_v43 = vld [vmem:[%s1230_s6] sm:$0x1f] }
 0x16a   : > { %v699_v52 = vmax.f32 %v677_v44, 0.0  ;;  %v797_v44 = vld [vmem:[%s1231_s7] sm:$0x1f] }
 0x16c   : > { %v716_v61 = vadd.f32 %v699_v52, %v698_v51 }
 0x16d   : > { %v688_v15 = vpop.f32.mrf.mxu3 }
 0x16e   : > { %v689_v16 = vadd.f32 %v688_v15, %v574_v13  ;;  %v638_v17 = vpop.f32.mrf.mxu0 }
 0x16f   : > { %v679_v19 = vpop.f32.mrf.mxu1  ;;  %v639_v39 = vadd.f32 %v638_v17, %v559_v31 }
 0x170   : > { %v707_v22 = vmax.f32 %v689_v16, 0.0  ;;  %v680_v40 = vadd.f32 %v679_v19, %v559_v31  ;;  %v749_v31 = vld [vmem:[%s1229_s5 + $0x18] sm:$0xff] }
 0x171   : > { %v700_v46 = vmax.f32 %v639_v39, 0.0 }
 0x172   : > { %v728_v23 = vadd.f32 %v707_v22, %v706_v21  ;;  %v701_v47 = vmax.f32 %v680_v40, 0.0  ;;  %v742_v21 = vld [vmem:[%s1228_s4] sm:$0xff]  ;;  %v743_v22 = vld [vmem:[%s1228_s4 + $0x8] sm:$0xff] }
 0x174   : > { %729 = vadd.xlane.f32.xlu2 %v728_v23  ;;  %v719_v57 = vadd.f32 %v701_v47, %v700_v46  ;;  %v744_v23 = vld [vmem:[%s1228_s4 + $0x10] sm:$0xff] }
 0x175   : > { %v691_v28 = vpop.f32.mrf.mxu3 }
 0x176   : > { %v692_v29 = vadd.f32 %v691_v28, %v579_v9  ;;  %v641_v30 = vpop.f32.mrf.mxu0 }
 0x177   : > { %v642_v32 = vadd.f32 %v641_v30, %v564_v18  ;;  %v682_v24 = vpop.f32.mrf.mxu1  ;;  %v748_v30 = vld [vmem:[%s1229_s5 + $0x10] sm:$0xff] }
 0x178   : > { %v709_v33 = vmax.f32 %v692_v29, 0.0  ;;  %v683_v34 = vadd.f32 %v682_v24, %v564_v18 }
 0x179   : > { %v702_v38 = vmax.f32 %v642_v32, 0.0  ;;  %v747_v32 = vld [vmem:[%s1229_s5 + $0x8] sm:$0xff] }
 0x17a   : > { %v703_v41 = vmax.f32 %v683_v34, 0.0  ;;  %v731_v42 = vadd.f32 %v709_v33, %v708_v26  ;;  %v746_v34 = vld [vmem:[%s1229_s5] sm:$0xff] }
 0x17c   : > { %732 = vadd.xlane.f32.xlu1 %v731_v42  ;;  %v722_v45 = vadd.f32 %v703_v41, %v702_v38 }
 0x17e   : > { %723 = vadd.xlane.f32.xlu2 %v722_v45  ;;  %v644_v37 = vpop.f32.mrf.mxu0 }
 0x17f   : > { %v645_v49 = vadd.f32 %v644_v37, %v569_v27  ;;  %v685_v50 = vpop.f32.mrf.mxu1 }
 0x180   : > { %v686_v53 = vadd.f32 %v685_v50, %v569_v27 }
 0x181   : > { %v704_v35 = vmax.f32 %v645_v49, 0.0 }
 0x182   : > { %v705_v56 = vmax.f32 %v686_v53, 0.0 }
 0x184   : > { %720 = vadd.xlane.f32.xlu1 %v719_v57  ;;  %v725_v60 = vadd.f32 %v705_v56, %v704_v35 }
 0x186   : > { %726 = vadd.xlane.f32.xlu0 %v725_v60  ;;  %717 = vadd.xlane.f32.xlu2 %v716_v61 }
 0x18c   : > { %711 = vadd.xlane.f32.xlu1 %v710_v2 }
 0x18e   : > { %714 = vadd.xlane.f32.xlu0 %v713_v3 }
 0x1e7   : > { %v730_v6 = vpop.xlane.xlu2 %729 }
 0x1e8   : > { %v740_v9 = vmul.f32 0.00390625, %v730_v6 }
 0x1ef   : > { %v733_v4 = vpop.xlane.xlu1 %732 }
 0x1f0   : > { %v741_v5 = vmul.f32 0.00390625, %v733_v4 }
 0x1f1   : > { %v724_v7 = vpop.xlane.xlu2 %723 }
 0x1f2   : > { %771 = vmatpush.msra.mxu2 %v741_v5  ;;  %v738_v12 = vmul.f32 0.00390625, %v724_v7 }
 0x1f4   : > { %772 = vmatpush.msra.mxu2 %v740_v9 }
 0x1f7   : > { %v721_v8 = vpop.xlane.xlu1 %720 }
 0x1f8   : > { %v737_v14 = vmul.f32 0.00390625, %v721_v8 }
 0x1f9   : > { %v727_v10 = vpop.xlane.xlu0 %726  ;;  %v718_v13 = vpop.xlane.xlu2 %717 }
 0x1fa   : > { %v739_v11 = vmul.f32 0.00390625, %v727_v10  ;;  %v736_v15 = vmul.f32 0.00390625, %v718_v13 }
 0x1fc   : > { %773 = vmatpush.msra.mxu2 %v739_v11 }
 0x1fe   : > { %774 = vmatpush.msra.mxu2 %v738_v12 }
 0x1ff   : > { %v712_v16 = vpop.xlane.xlu1 %711 }
 0x200   : > { %775 = vmatpush.msra.mxu2 %v737_v14  ;;  %v734_v19 = vmul.f32 0.00390625, %v712_v16 }
 0x201   : > { %v715_v17 = vpop.xlane.xlu0 %714 }
 0x202   : > { %v735_v18 = vmul.f32 0.00390625, %v715_v17  ;;  %776 = vmatpush.msra.mxu2 %v736_v15 }
 0x204   : > { %777 = vmatpush.msra.mxu2 %v735_v18 }
 0x206   : > { %778 = vmatpush.msra.mxu2 %v734_v19 }
 0x207   : > { %911 = vmatmul.msk.f32.vlgmr.msra.gmra.mxu2 %vm750_vm10, %v742_v21 }
 0x20f   : > { %912 = vmatmul.msk.f32.gmra.mxu2 %vm750_vm10, %v743_v22 }
 0x217   : > { %913 = vmatmul.msk.f32.gmra.mxu2 %vm750_vm10, %v744_v23 }
 0x21f   : > { %914 = vmatmul.msk.f32.gmra.mxu2 %vm750_vm10, %v745_v25 }
 0x28a   : > { %v780_v27 = vpop.f32.mrf.mxu2 }
 0x28b   : > { %v781_v39 = vadd.f32 %v780_v27, %v746_v34 }
 0x28d   : > { %v792_v42 = vmax.f32 %v781_v39, 0.0 }
 0x292   : > { %v783_v28 = vpop.f32.mrf.mxu2 }
 0x293   : > { %v784_v36 = vadd.f32 %v783_v28, %v747_v32 }
 0x295   : > { %v793_v41 = vmax.f32 %v784_v36, 0.0 }
 0x29a   : > { %v786_v29 = vpop.f32.mrf.mxu2 }
 0x29b   : > { %v787_v26 = vadd.f32 %v786_v29, %v748_v30 }
 0x29d   : > { %v794_v40 = vmax.f32 %v787_v26, 0.0 }
 0x2a2   : > { %v789_v24 = vpop.f32.mrf.mxu2 }
 0x2a3   : > { %v790_v33 = vadd.f32 %v789_v24, %v749_v31 }
 0x2a5   : > { %v795_v38 = vmax.f32 %v790_v33, 0.0 }
 0x2a7   : > { %814 = vmatpush.msra.mxu3 %v795_v38 }
 0x2a9   : > { %815 = vmatpush.msra.mxu3 %v794_v40 }
 0x2ab   : > { %816 = vmatpush.msra.mxu3 %v793_v41 }
 0x2ad   : > { %817 = vmatpush.msra.mxu3 %v792_v42 }
 0x2ae   : > { %915 = vmatmul.msk.f32.vlgmr.msra.gmra.mxu3 %vm798_vm11, %v796_v43 }
 0x331   : > { %v819_v45 = vpop.f32.mrf.mxu3 }
 0x332   : > { %v820_v46 = vadd.f32 %v819_v45, %v797_v44 }
 0x334   : > { %823 = vst.msk [vmem:[%s305_s13] sm:$0x1f] %vm822_vm12, %v820_v46 }
 0x335 PF: > { %s18_s27 = sadd.s32 1, %s954_s27  }
 0x336   : > { %p15_p5 = scmp.ge.s32.totalorder %s18_s27, 4  }
 0x338   :  { %17 = sbr.rel (!%p15_p5) target bundleno = 1 (0x1), region = 90 }

</bundles_post_ra>
